<compile_context>
chip_gen: v7x
topology: tpu7x:2x2x1
jax: 0.10.0
libtpu: 0.0.40
codegen_flags: <defaults>
</compile_context>

<pallas_src>
import functools
import math

import jax
import jax.numpy as jnp
import numpy as np
from jax import lax
from jax.experimental import pallas as pl
from jax.experimental.pallas import tpu as pltpu

LRELU_SLOPE = 0.1       # modules.LRELU_SLOPE in the reference code
_LANE = 128             # lane width
_SUB = 16               # bf16 packs 16 sublanes/vreg (also a multiple of 8 for f32)
_HALO = 128             # halo block width; covers pad_lo and dilation*(K-1) <= 128


def _round_up(v, m):
    return (v + m - 1) // m * m


def _cdiv(a, b):
    return -(-a // b)


def _cp(c):
    """Channel padding to the bf16 sublane tile."""
    return _round_up(max(int(c), _SUB), _SUB)


def _tpu_vmem_capacity_bytes():
    try:
        return int(pltpu.get_tpu_info().vmem_capacity_bytes)
    except Exception:        # conservative fallback: v7x per-TensorCore VMEM
        return 64 << 20


_VMEM_CAP = _tpu_vmem_capacity_bytes()
# Budget used by the L_tile chooser (double-buffered blocks + in-kernel
# temporaries); _VMEM_LIMIT is what Mosaic is allowed to allocate.
_TILE_BUDGET = max(8 << 20, min(int(_VMEM_CAP * 0.35), 36 << 20))
_VMEM_LIMIT = max(32 << 20, min(int(_VMEM_CAP * 0.8), 100 << 20))


# ----------------------------------------------------------------------------
# Pallas kernel: one (batch, L-tile) grid point of a stride-1 dilated conv1d
# over canonical tensors.
# ----------------------------------------------------------------------------
def _conv1d_kernel(*refs, n_res, K, dil, L_tile, tap0, valid_lo, valid_hi,
                   pre_slope, post_tanh):
    xl_ref, xm_ref, xr_ref, w_ref, b_ref = refs[:5]
    res_refs = refs[5:5 + n_res]
    o_ref = refs[5 + n_res]

    # (Cin_p, L_tile + 2*HALO): left halo | main tile | right halo.
    xw = jnp.concatenate([xl_ref[0], xm_ref[0], xr_ref[0]], axis=-1)
    if pre_slope is not None:
        # native-dtype leaky-relu (bf16 VALU on v6e/v7x); lrelu(0)=0 so the
        # canonical zero padding stays zero.
        xw = jnp.where(xw > 0, xw, xw * jnp.asarray(pre_slope, xw.dtype))

    # im2col: K statically shifted taps stacked along the contraction dim so
    # the MXU sees a single matmul of depth K*Cin_p.
    taps = [xw[:, tap0 + k * dil: tap0 + k * dil + L_tile] for k in range(K)]
    col = taps[0] if K == 1 else jnp.concatenate(taps, axis=0)

    acc = jnp.dot(w_ref[...], col, preferred_element_type=jnp.float32)
    acc = acc + b_ref[...]                       # (Cout_p, 1) f32 broadcast
    for r_ref in res_refs:                       # fused residual adds
        acc = acc + r_ref[0].astype(jnp.float32)
    if post_tanh:
        acc = jnp.tanh(acc)

    # keep the canonical-format invariant: zeros outside [valid_lo, valid_hi)
    gcol = pl.program_id(1) * L_tile + lax.broadcasted_iota(
        jnp.int32, (1, L_tile), 1)
    acc = jnp.where((gcol >= valid_lo) & (gcol < valid_hi), acc, 0.0)
    o_ref[0] = acc.astype(o_ref.dtype)


# ----------------------------------------------------------------------------
# conv1d wrapper over canonical tensors
# ----------------------------------------------------------------------------
def pallas_conv1d(x_can, w_groups, b_groups, *, k_span, dilation, pad_lo,
                  out_len, l_tile, cin, in_ch_block=0, pre_lrelu_slope=None,
                  post_tanh=False, residuals=(), residual_blocks=None,
                  act_dtype=jnp.bfloat16, out_dtype=None, w_scale=1.0):
    """Stride-1 dilated conv1d over canonical tensors.

    x_can: (B, C_store, W) canonical activation; input channels are the
           in_ch_block-th block of Cin_p=round16(cin) rows.
    w_groups: list of (Cout, cin, k_span) torch-layout weights (equal Cout);
              each group becomes its own Cout_p channel block of the output.
    residuals: canonical tensors added in the epilogue (their residual_blocks
               channel block is used).
    Returns a canonical (B, len(w_groups)*Cout_p, W) tensor.
    """
    B, c_store, W = x_can.shape
    assert W % l_tile == 0 and l_tile % _HALO == 0
    n_tiles = W // l_tile
    assert W >= 2 * _HALO + out_len
    tap0 = _HALO - pad_lo
    assert 0 <= tap0 and tap0 + dilation * (k_span - 1) <= 2 * _HALO, \
        "conv footprint exceeds the 128-lane halo"

    cin_p = _cp(cin)
    assert (in_ch_block + 1) * cin_p <= c_store
    n_g = len(w_groups)
    cout = w_groups[0].shape[0]
    cout_p = _cp(cout)
    cout_tot = n_g * cout_p
    out_dtype = out_dtype or act_dtype
    isz = jnp.dtype(act_dtype).itemsize

    # weights -> (n_groups*Cout_p, k_span*Cin_p); tap-major columns to match
    # the in-kernel im2col stacking.  1/num_kernels folds in via w_scale.
    wrows, brows = [], []
    for g in range(n_g):
        wg = w_groups[g].astype(jnp.float32)
        assert wg.shape == (cout, cin, k_span)
        wp = jnp.pad(wg, ((0, cout_p - cout), (0, cin_p - cin), (0, 0)))
        wrows.append(jnp.transpose(wp, (0, 2, 1)).reshape(cout_p, k_span * cin_p))
        bg = b_groups[g]
        bv = jnp.zeros((cout,), jnp.float32) if bg is None else bg.astype(jnp.float32)
        brows.append(jnp.pad(bv, (0, cout_p - cout)))
    wmat = wrows[0] if n_g == 1 else jnp.concatenate(wrows, axis=0)
    if w_scale != 1.0:
        wmat = wmat * jnp.float32(w_scale)
    wmat = wmat.astype(act_dtype)
    bvec = (brows[0] if n_g == 1 else jnp.concatenate(brows)).reshape(cout_tot, 1)

    r = l_tile // _HALO
    n_halo_blocks = W // _HALO
    cb = in_ch_block

    in_specs = [
        pl.BlockSpec((1, cin_p, _HALO),
                     lambda bi, li: (bi, cb, jnp.maximum(li * r - 1, 0))),
        pl.BlockSpec((1, cin_p, l_tile), lambda bi, li: (bi, cb, li)),
        pl.BlockSpec((1, cin_p, _HALO),
                     lambda bi, li: (bi, cb,
                                     jnp.minimum((li + 1) * r,
                                                 n_halo_blocks - 1))),
        pl.BlockSpec((cout_tot, k_span * cin_p), lambda bi, li: (0, 0)),
        pl.BlockSpec((cout_tot, 1), lambda bi, li: (0, 0)),
    ]
    inputs = [x_can, x_can, x_can, wmat, bvec]

    res_blocks = (tuple(residual_blocks) if residual_blocks is not None
                  else (0,) * len(residuals))
    for res, blk in zip(residuals, res_blocks):
        assert res.shape[0] == B and res.shape[2] == W
        assert (blk + 1) * cout_tot <= res.shape[1]
        in_specs.append(pl.BlockSpec((1, cout_tot, l_tile),
                                     lambda bi, li, _b=blk: (bi, _b, li)))
        inputs.append(res)

    kernel = functools.partial(
        _conv1d_kernel, n_res=len(residuals), K=k_span, dil=dilation,
        L_tile=l_tile, tap0=tap0, valid_lo=_HALO, valid_hi=_HALO + out_len,
        pre_slope=pre_lrelu_slope, post_tanh=post_tanh)

    osz = jnp.dtype(out_dtype).itemsize
    cost = pl.CostEstimate(
        flops=int(2 * B * cout_tot * k_span * cin_p * W),
        transcendentals=int(B * cout_tot * W) if post_tanh else 0,
        bytes_accessed=int(B * W * (cin_p * isz * (1.0 + 2.0 * _HALO / l_tile)
                                    + len(residuals) * cout_tot * isz
                                    + cout_tot * osz)
                           + wmat.size * isz + bvec.size * 4))

    return pl.pallas_call(
        kernel,
        out_shape=jax.ShapeDtypeStruct((B, cout_tot, W), out_dtype),
        grid_spec=pltpu.PrefetchScalarGridSpec(
            num_scalar_prefetch=0,
            grid=(B, n_tiles),
            in_specs=in_specs,
            out_specs=pl.BlockSpec((1, cout_tot, l_tile),
                                   lambda bi, li: (bi, 0, li)),
        ),
        compiler_params=pltpu.CompilerParams(
            dimension_semantics=("parallel", "parallel"),
            vmem_limit_bytes=_VMEM_LIMIT),
        cost_estimate=cost,
    )(*inputs)


def _to_canonical(x, c_pad, width, dtype):
    B, C, L = x.shape
    assert C <= c_pad and _HALO + L <= width
    return jnp.pad(x.astype(dtype),
                   ((0, 0), (0, c_pad - C), (_HALO, width - _HALO - L)))


# ----------------------------------------------------------------------------
# ConvTranspose1d as a polyphase stride-1 conv (u output-phase groups) plus a
# single interleave back into the next level's canonical layout.
# ----------------------------------------------------------------------------
def pallas_upsample(x_can, w, b, *, stride, padding, l_in, lt, w_next,
                    pre_lrelu_slope=None, act_dtype=jnp.bfloat16, w_scale=1.0):
    B, _, W_in = x_can.shape
    Cin, Cout, kt = w.shape
    u, p = stride, padding
    L_out = (l_in - 1) * u - 2 * p + kt
    M = _cdiv(L_out, u)
    assert W_in % lt == 0 and W_in >= 2 * _HALO + M

    j0 = [(r + p) % u for r in range(u)]
    A = [0 if j0[r] >= kt else _cdiv(kt - j0[r], u) for r in range(u)]
    c = [(r + p) // u for r in range(u)]
    o_lo = min(c[r] - A[r] + 1 for r in range(u))
    n_uni = max(c) - o_lo + 1

    wf = w.astype(jnp.float32)
    w_groups, b_groups = [], []
    for r in range(u):
        wr = jnp.zeros((Cout, Cin, n_uni), jnp.float32)
        for a in range(A[r]):
            q = c[r] - a - o_lo
            wr = wr.at[:, :, q].set(wf[:, :, j0[r] + a * u].T)
        w_groups.append(wr)
        b_groups.append(b)

    y = pallas_conv1d(x_can, w_groups, b_groups, k_span=n_uni, dilation=1,
                      pad_lo=-o_lo, out_len=M, l_tile=lt, cin=Cin,
                      pre_lrelu_slope=pre_lrelu_slope, act_dtype=act_dtype,
                      w_scale=w_scale)

    # interleave the u phase groups and re-base to the next level's canonical
    # layout.  TODO(synk): fold this interleave into the consumer's index_map
    # (phase-major im2col) to drop the remaining per-stage formatting pass.
    cout_p = _cp(Cout)
    W_m = y.shape[-1]
    y = y.reshape(B, u, cout_p, W_m)
    y = jnp.transpose(y, (0, 2, 3, 1)).reshape(B, cout_p, W_m * u)
    if u * M != L_out:      # odd (k-u) configs: zero the over-computed tail
        col = lax.broadcasted_iota(jnp.int32, (1, 1, W_m * u), 2)
        y = jnp.where(col < u * _HALO + L_out, y, jnp.zeros((), y.dtype))
    start = (u - 1) * _HALO
    take = min(w_next, W_m * u - start)
    y = y[:, :, start:start + take]
    if take < w_next:
        y = jnp.pad(y, ((0, 0), (0, 0), (0, w_next - take)))
    return y, L_out


# ----------------------------------------------------------------------------
# L_tile planning (chip / generation aware)
# ----------------------------------------------------------------------------
def _choose_l_tile(layers, l_out, budget, isz):
    cap = _round_up(2 * _HALO + l_out, _LANE)

    def need(lt):
        worst = 0
        for (cin_p, cout_p, k, n_res, osz) in layers:
            blocks = ((cin_p * (lt + 2 * _HALO) + n_res * cout_p * lt) * isz
                      + cout_p * lt * osz + cout_p * k * cin_p * isz)
            scratch = (cin_p * (lt + 2 * _HALO) * isz
                       + k * cin_p * lt * isz + cout_p * lt * 4)
            worst = max(worst, 2 * blocks + scratch)
        return worst + (1 << 20)

    lt = 8192
    while lt > _LANE:
        eff = min(lt, cap)
        if need(eff) <= budget:
            return eff
        lt //= 2
    return _LANE


def _plan_levels(cfg, c0, l0, act_dtype):
    isz = jnp.dtype(act_dtype).itemsize
    uic = cfg['upsample_initial_channel']
    urs, uks = cfg['upsample_rates'], cfg['upsample_kernel_sizes']
    ks = cfg['resblock_kernel_sizes']
    nk = len(ks)
    nst = len(urs)
    ch = [uic // (2 ** i) for i in range(nst + 1)]

    plans = []
    L = l0
    for lvl in range(nst + 1):
        layers = []
        if lvl == 0:
            layers.append((_cp(c0), _cp(uic), 7, 0, isz))                # conv_pre
        else:
            chp = _cp(ch[lvl])
            kmax = max(ks)
            layers.append((chp, nk * chp, kmax, 0, isz))                 # fused conv1
            layers.append((chp, chp, kmax, 2, isz))                      # conv2 + 2 res
        if lvl < nst:
            u, k = urs[lvl], uks[lvl]
            layers.append((_cp(ch[lvl]), u * _cp(ch[lvl + 1]),
                           k // u + 2, 0, isz))                          # polyphase
        if lvl == nst:
            layers.append((_cp(ch[nst]), _cp(1), 7, 0, 4))               # conv_post
        lt = _choose_l_tile(layers, L, _TILE_BUDGET, isz)
        n_t = _cdiv(2 * _HALO + L, lt)
        plans.append({'L': L, 'lt': lt, 'W': n_t * lt})
        if lvl < nst:
            u, k = urs[lvl], uks[lvl]
            L = (L - 1) * u - 2 * ((k - u) // 2) + k
    return plans, ch


# ----------------------------------------------------------------------------
# Generator (ResBlock1 variant).  weight_norm is a reparameterization only;
# plain weights are used directly.
# ----------------------------------------------------------------------------
def _stage_resblocks(x, rbs, *, ch, l, lt, act_dtype):
    nk = len(rbs)
    d0s = [rb['convs1'][0][2] for rb in rbs]
    k0s = [rb['convs1'][0][0].shape[-1] for rb in rbs]
    kmax = max(k0s)
    can_fuse = (nk > 1 and len(set(d0s)) == 1
                and all((kmax - kk) % 2 == 0 for kk in k0s))

    xt_all = None
    if can_fuse:
        # fuse the nk first convs (they all read the same x) into one call with
        # nk*Cout_p output channel blocks (smaller kernels zero-padded to kmax).
        d0 = d0s[0]
        wg, bg = [], []
        for rb in rbs:
            w1, b1, _d, _p = rb['convs1'][0]
            off = (kmax - w1.shape[-1]) // 2
            wg.append(jnp.pad(w1, ((0, 0), (0, 0),
                                   (off, kmax - w1.shape[-1] - off))))
            bg.append(b1)
        xt_all = pallas_conv1d(x, wg, bg, k_span=kmax, dilation=d0,
                               pad_lo=d0 * (kmax - 1) // 2, out_len=l,
                               l_tile=lt, cin=ch, pre_lrelu_slope=LRELU_SLOPE,
                               act_dtype=act_dtype)

    acc = None
    for j, rb in enumerate(rbs):
        x0 = x
        depth = len(rb['convs1'])
        for m in range(depth):
            w1, b1, d1, p1 = rb['convs1'][m]
            w2, b2, p2 = rb['convs2'][m]
            if m == 0 and xt_all is not None:
                xt_src, xt_blk = xt_all, j
            else:
                xt_src = pallas_conv1d(x0, [w1], [b1], k_span=w1.shape[-1],
                                       dilation=d1, pad_lo=p1, out_len=l,
                                       l_tile=lt, cin=ch,
                                       pre_lrelu_slope=LRELU_SLOPE,
                                       act_dtype=act_dtype)
                xt_blk = 0
            res, rblk = [x0], [0]
            if m == depth - 1 and acc is not None:
                # chain the running sum of resblock outputs through the
                # epilogue (replaces the xs accumulation HBM passes).
                res.append(acc)
                rblk.append(0)
            x0 = pallas_conv1d(xt_src, [w2], [b2], k_span=w2.shape[-1],
                               dilation=1, pad_lo=p2, out_len=l, l_tile=lt,
                               cin=ch, in_ch_block=xt_blk,
                               pre_lrelu_slope=LRELU_SLOPE,
                               residuals=res, residual_blocks=rblk,
                               act_dtype=act_dtype)
        acc = x0
    return acc


def generator_forward(x, params, cfg, act_dtype=jnp.bfloat16):
    assert cfg.get('resblock', '1') == '1'
    # TODO(synk): ResBlock2 variant, hier_forward and g-conditioning
    # (gin_channels > 0) are not exercised here; g=None forward path only.
    B, c0, l0 = x.shape
    urs, uks = cfg['upsample_rates'], cfg['upsample_kernel_sizes']
    nk = len(cfg['resblock_kernel_sizes'])
    plans, ch = _plan_levels(cfg, c0, l0, act_dtype)

    xc = _to_canonical(x, _cp(c0), plans[0]['W'], act_dtype)
    xc = pallas_conv1d(xc, [params['conv_pre_w']], [params['conv_pre_b']],
                       k_span=7, dilation=1, pad_lo=3, out_len=plans[0]['L'],
                       l_tile=plans[0]['lt'], cin=c0, act_dtype=act_dtype)

    for i, (u, k) in enumerate(zip(urs, uks)):
        pin, pout = plans[i], plans[i + 1]
        wsc = 1.0 if i == 0 else 1.0 / nk      # folded 1/num_kernels
        xc, l_up = pallas_upsample(xc, params['ups'][i]['w'],
                                   params['ups'][i]['b'], stride=u,
                                   padding=(k - u) // 2, l_in=pin['L'],
                                   lt=pin['lt'], w_next=pout['W'],
                                   pre_lrelu_slope=LRELU_SLOPE,
                                   act_dtype=act_dtype, w_scale=wsc)
        assert l_up == pout['L']
        xc = _stage_resblocks(xc, params['resblocks'][i * nk:(i + 1) * nk],
                              ch=ch[i + 1], l=pout['L'], lt=pout['lt'],
                              act_dtype=act_dtype)

    pn = plans[-1]
    # F.leaky_relu (default slope 0.01), conv_posts[-1] (bias=False), tanh; the
    # trailing 1/nk of the resblock average is folded into the weights.
    y = pallas_conv1d(xc, [params['conv_post_w']], [None], k_span=7,
                      dilation=1, pad_lo=3, out_len=pn['L'], l_tile=pn['lt'],
                      cin=ch[-1], pre_lrelu_slope=0.01, post_tanh=True,
                      act_dtype=act_dtype, out_dtype=jnp.float32,
                      w_scale=1.0 / nk)
    return y[:, :1, _HALO:_HALO + pn['L']]


# ----------------------------------------------------------------------------
# Pure-JAX reference (lax convs) mirroring the same numerics (bf16
# activations/weights, f32 accumulation, folded 1/nk, same cast points).
# ----------------------------------------------------------------------------
def _ref_lrelu(x, slope):
    return jnp.where(x > 0, x, x * jnp.asarray(slope, x.dtype))


def _ref_conv1d(x, w, b, pad, dil, pre_slope=None, post_tanh=False,
                residual=None, residual2=None, act_dtype=jnp.bfloat16,
                out_dtype=None, w_scale=1.0):
    out_dtype = out_dtype or act_dtype
    xx = x.astype(act_dtype)
    if pre_slope is not None:
        xx = _ref_lrelu(xx, pre_slope)
    wk = (w.astype(jnp.float32) * jnp.float32(w_scale)).astype(act_dtype)
    y = lax.conv_general_dilated(
        xx, wk, window_strides=(1,), padding=[(pad, pad)], rhs_dilation=(dil,),
        dimension_numbers=('NCH', 'OIH', 'NCH'),
        preferred_element_type=jnp.float32, precision=lax.Precision.HIGHEST)
    if b is not None:
        y = y + b.astype(jnp.float32)[None, :, None]
    if residual is not None:
        y = y + residual.astype(jnp.float32)
    if residual2 is not None:
        y = y + residual2.astype(jnp.float32)
    if post_tanh:
        y = jnp.tanh(y)
    return y.astype(out_dtype)


def _ref_conv_transpose1d(x, w, b, stride, padding, pre_slope=None,
                          act_dtype=jnp.bfloat16, w_scale=1.0):
    xx = x.astype(act_dtype)
    if pre_slope is not None:
        xx = _ref_lrelu(xx, pre_slope)
    Cin, Cout, K = w.shape
    wk = (jnp.flip(jnp.transpose(w, (1, 0, 2)), axis=-1).astype(jnp.float32)
          * jnp.float32(w_scale)).astype(act_dtype)
    y = lax.conv_general_dilated(
        xx, wk, window_strides=(1,), padding=[(K - 1 - padding,) * 2],
        lhs_dilation=(stride,), dimension_numbers=('NCH', 'OIH', 'NCH'),
        preferred_element_type=jnp.float32, precision=lax.Precision.HIGHEST)
    y = y + b.astype(jnp.float32)[None, :, None]
    return y.astype(act_dtype)


def ref_generator_forward(x, params, cfg, act_dtype=jnp.bfloat16):
    nk = len(cfg['resblock_kernel_sizes'])
    urs, uks = cfg['upsample_rates'], cfg['upsample_kernel_sizes']
    x = _ref_conv1d(x, params['conv_pre_w'], params['conv_pre_b'], 3, 1,
                    act_dtype=act_dtype)
    for i, (u, k) in enumerate(zip(urs, uks)):
        wsc = 1.0 if i == 0 else 1.0 / nk
        x = _ref_conv_transpose1d(x, params['ups'][i]['w'],
                                  params['ups'][i]['b'], u, (k - u) // 2,
                                  pre_slope=LRELU_SLOPE, act_dtype=act_dtype,
                                  w_scale=wsc)
        acc = None
        for j in range(nk):
            rb = params['resblocks'][i * nk + j]
            x0 = x
            depth = len(rb['convs1'])
            for m in range(depth):
                w1, b1, d1, p1 = rb['convs1'][m]
                w2, b2, p2 = rb['convs2'][m]
                xt = _ref_conv1d(x0, w1, b1, p1, d1, pre_slope=LRELU_SLOPE,
                                 act_dtype=act_dtype)
                extra = acc if (m == depth - 1 and acc is not None) else None
                x0 = _ref_conv1d(xt, w2, b2, p2, 1, pre_slope=LRELU_SLOPE,
                                 residual=x0, residual2=extra,
                                 act_dtype=act_dtype)
            acc = x0
        x = acc
    x = _ref_conv1d(x, params['conv_post_w'], None, 3, 1, pre_slope=0.01,
                    post_tanh=True, act_dtype=act_dtype,
                    out_dtype=jnp.float32, w_scale=1.0 / nk)
    return x


# ----------------------------------------------------------------------------
# Deterministic parameter init (shapes follow Generator.__init__), fan-in
# scaled so activations stay O(1).
# ----------------------------------------------------------------------------
def init_params(key, cfg):
    ic = cfg['initial_channel']
    uic = cfg['upsample_initial_channel']
    ks = cfg['resblock_kernel_sizes']
    ds = cfg['resblock_dilation_sizes']
    urs = cfg['upsample_rates']
    uks = cfg['upsample_kernel_sizes']
    keys = iter(jax.random.split(key, 512))

    def conv_w(cout, cin, k):
        s = 1.0 / math.sqrt(cin * k)
        return s * jax.random.normal(next(keys), (cout, cin, k), jnp.float32)

    def convT_w(cin, cout, k):
        s = 1.0 / math.sqrt(cin * k)
        return s * jax.random.normal(next(keys), (cin, cout, k), jnp.float32)

    def bias(c):
        return 0.1 * jax.random.normal(next(keys), (c,), jnp.float32)

    params = {'conv_pre_w': conv_w(uic, ic, 7), 'conv_pre_b': bias(uic),
              'ups': [], 'resblocks': []}
    for i, (u, k) in enumerate(zip(urs, uks)):
        cin = uic // 2 ** i
        cout = uic // 2 ** (i + 1)
        params['ups'].append({'w': convT_w(cin, cout, k), 'b': bias(cout)})
        ch = cout
        for kk, dd in zip(ks, ds):
            convs1, convs2 = [], []
            for d in dd:
                convs1.append((conv_w(ch, ch, kk), bias(ch), d, d * (kk - 1) // 2))
                convs2.append((conv_w(ch, ch, kk), bias(ch), (kk - 1) // 2))
            params['resblocks'].append({'convs1': convs1, 'convs2': convs2})
    ch_last = uic // 2 ** len(urs)
    params['conv_post_w'] = conv_w(1, ch_last, 7)   # bias=False
    return params


# ----------------------------------------------------------------------------
# test helpers
# ----------------------------------------------------------------------------
def _conv_for_test(x, w, b, *, pad, dil, pre_slope=None, residual=None,
                   l_tile=256):
    B, C, L = x.shape
    Cout, _, K = w.shape
    out_len = L + 2 * pad - dil * (K - 1)
    W = _cdiv(2 * _HALO + max(L, out_len), l_tile) * l_tile
    xc = _to_canonical(x, _cp(C), W, jnp.bfloat16)
    res = []
    if residual is not None:
        res = [_to_canonical(residual, _cp(Cout), W, jnp.bfloat16)]
    y = pallas_conv1d(xc, [w], [b], k_span=K, dilation=dil, pad_lo=pad,
                      out_len=out_len, l_tile=l_tile, cin=C,
                      pre_lrelu_slope=pre_slope, residuals=res,
                      act_dtype=jnp.bfloat16)
    return y[:, :Cout, _HALO:_HALO + out_len]


def _check(a, b, rtol, atol):
    np.testing.assert_allclose(np.asarray(a.astype(jnp.float32)),
                               np.asarray(b.astype(jnp.float32)),
                               rtol=rtol, atol=atol)


if __name__ == "__main__":
    key = jax.random.PRNGKey(0)
    pkey, xkey, k1, k2, k3, k4, k5, k6, k7 = jax.random.split(key, 9)

    # --- unit check 1: multi-tile dilated conv, fused lrelu/bias/residual ---
    xc = jax.random.normal(k1, (2, 16, 300), jnp.float32)
    wc = 0.2 * jax.random.normal(k2, (16, 16, 5), jnp.float32)
    bc = 0.1 * jax.random.normal(k3, (16,), jnp.float32)
    rc = jax.random.normal(k4, (2, 16, 300), jnp.bfloat16)
    got = _conv_for_test(xc, wc, bc, pad=6, dil=3, pre_slope=LRELU_SLOPE,
                         residual=rc, l_tile=256)
    want = _ref_conv1d(xc, wc, bc, 6, 3, pre_slope=LRELU_SLOPE, residual=rc)
    _check(jax.block_until_ready(got), want, 1e-2, 2e-3)

    # --- unit check 2: polyphase transposed conv vs lax lhs_dilation conv ---
    xt = jax.random.normal(k5, (2, 16, 50), jnp.float32)
    wt = 0.2 * jax.random.normal(k6, (16, 8, 7), jnp.float32)
    bt = 0.1 * jax.random.normal(k7, (8,), jnp.float32)
    lt_in = 128
    w_in = _cdiv(2 * _HALO + 50, lt_in) * lt_in
    xt_can = _to_canonical(xt, _cp(16), w_in, jnp.bfloat16)
    l_up_exp = (50 - 1) * 3 - 2 * 2 + 7
    w_next = _cdiv(2 * _HALO + l_up_exp, 256) * 256
    got, l_up = pallas_upsample(xt_can, wt, bt, stride=3, padding=2, l_in=50,
                                lt=lt_in, w_next=w_next,
                                pre_lrelu_slope=LRELU_SLOPE,
                                act_dtype=jnp.bfloat16)
    got = got[:, :8, _HALO:_HALO + l_up]
    want = _ref_conv_transpose1d(xt, wt, bt, 3, 2, pre_slope=LRELU_SLOPE)
    _check(jax.block_until_ready(got), want, 1e-2, 2e-3)

    # --- full generator forward (bf16 activations, f32 accumulation) ---
    cfg = dict(
        initial_channel=4,
        resblock='1',
        resblock_kernel_sizes=[3, 5],
        resblock_dilation_sizes=[[1, 3, 5], [1, 3, 5]],
        upsample_rates=[2, 2],
        upsample_initial_channel=32,
        upsample_kernel_sizes=[4, 4],
        gin_channels=0,
    )
    params = init_params(pkey, cfg)

    B, L = 2, 32
    x = jax.random.normal(xkey, (B, cfg['initial_channel'], L), jnp.float32)

    out = jax.block_until_ready(generator_forward(x, params, cfg))
    expected_len = L
    for u in cfg['upsample_rates']:
        expected_len *= u
    assert out.shape == (B, 1, expected_len), out.shape
    assert bool(jnp.all(jnp.isfinite(out)))

    ref = jax.block_until_ready(ref_generator_forward(x, params, cfg))
    _check(out, ref, 3e-2, 6e-3)

    print("KERNEL_OK")
</pallas_src>

<mosaic_0001>
module attributes {stable_mosaic.version = 11 : i64} {
  func.func @_conv1d_kernel(%arg0: i32, %arg1: i32, %arg2: memref<1x16x128xbf16, #tpu.memory_space<vmem>>, %arg3: memref<1x16x256xbf16, #tpu.memory_space<vmem>>, %arg4: memref<1x16x128xbf16, #tpu.memory_space<vmem>>, %arg5: memref<16x80xbf16, #tpu.memory_space<vmem>>, %arg6: memref<16x1xf32, #tpu.memory_space<vmem>>, %arg7: memref<1x16x256xbf16, #tpu.memory_space<vmem>>, %arg8: memref<1x16x256xbf16, #tpu.memory_space<vmem>>) attributes {dimension_semantics = [#tpu.dimension_semantics<parallel>, #tpu.dimension_semantics<parallel>], iteration_bounds = array<i64: 2, 3>, scalar_prefetch = 0 : i64, scratch_operands = 0 : i64, tpu.core_type = #tpu.core_type<tc>, window_params = [{transform_indices = @transform_0, window_bounds = array<i64: 1, 16, 128>}, {transform_indices = @transform_1, window_bounds = array<i64: 1, 16, 256>}, {transform_indices = @transform_2, window_bounds = array<i64: 1, 16, 128>}, {pipeline_mode = #tpu.pipeline_mode<synchronous>, transform_indices = @transform_3, window_bounds = array<i64: 16, 80>}, {pipeline_mode = #tpu.pipeline_mode<synchronous>, transform_indices = @transform_4, window_bounds = array<i64: 16, 1>}, {transform_indices = @transform_5, window_bounds = array<i64: 1, 16, 256>}, {transform_indices = @transform_6, window_bounds = array<i64: 1, 16, 256>}]} {
    %c0 = arith.constant 0 : index
    %c0_0 = arith.constant 0 : index
    %c0_1 = arith.constant 0 : index
    %0 = vector.load %arg2[%c0, %c0_0, %c0_1] : memref<1x16x128xbf16, #tpu.memory_space<vmem>>, vector<1x16x128xbf16>
    %1 = vector.shape_cast %0 : vector<1x16x128xbf16> to vector<16x128xbf16>
    %c0_2 = arith.constant 0 : index
    %c0_3 = arith.constant 0 : index
    %c0_4 = arith.constant 0 : index
    %2 = vector.load %arg3[%c0_2, %c0_3, %c0_4] : memref<1x16x256xbf16, #tpu.memory_space<vmem>>, vector<1x16x256xbf16>
    %3 = vector.shape_cast %2 : vector<1x16x256xbf16> to vector<16x256xbf16>
    %c0_5 = arith.constant 0 : index
    %c0_6 = arith.constant 0 : index
    %c0_7 = arith.constant 0 : index
    %4 = vector.load %arg4[%c0_5, %c0_6, %c0_7] : memref<1x16x128xbf16, #tpu.memory_space<vmem>>, vector<1x16x128xbf16>
    %5 = vector.shape_cast %4 : vector<1x16x128xbf16> to vector<16x128xbf16>
    %6 = tpu.concatenate %1, %3, %5 in 1 : vector<16x128xbf16>, vector<16x256xbf16>, vector<16x128xbf16> -> vector<16x512xbf16>
    %cst = arith.constant 0.000000e+00 : bf16
    %7 = vector.broadcast %cst : bf16 to vector<16x512xbf16>
    %8 = arith.cmpf ogt, %6, %7 : vector<16x512xbf16>
    %cst_8 = arith.constant 1.000980e-01 : bf16
    %9 = vector.broadcast %cst_8 : bf16 to vector<16x512xbf16>
    %10 = arith.mulf %6, %9 : vector<16x512xbf16>
    %11 = arith.select %8, %6, %10 : vector<16x512xi1>, vector<16x512xbf16>
    %12 = vector.extract_strided_slice %11 {offsets = [0, 122], sizes = [16, 256], strides = [1, 1]} : vector<16x512xbf16> to vector<16x256xbf16>
    %13 = vector.extract_strided_slice %11 {offsets = [0, 125], sizes = [16, 256], strides = [1, 1]} : vector<16x512xbf16> to vector<16x256xbf16>
    %14 = vector.extract_strided_slice %11 {offsets = [0, 128], sizes = [16, 256], strides = [1, 1]} : vector<16x512xbf16> to vector<16x256xbf16>
    %15 = vector.extract_strided_slice %11 {offsets = [0, 131], sizes = [16, 256], strides = [1, 1]} : vector<16x512xbf16> to vector<16x256xbf16>
    %16 = vector.extract_strided_slice %11 {offsets = [0, 134], sizes = [16, 256], strides = [1, 1]} : vector<16x512xbf16> to vector<16x256xbf16>
    %17 = tpu.concatenate %12, %13, %14, %15, %16 in 0 : vector<16x256xbf16>, vector<16x256xbf16>, vector<16x256xbf16>, vector<16x256xbf16>, vector<16x256xbf16> -> vector<80x256xbf16>
    %c0_9 = arith.constant 0 : index
    %c0_10 = arith.constant 0 : index
    %18 = vector.load %arg5[%c0_9, %c0_10] : memref<16x80xbf16, #tpu.memory_space<vmem>>, vector<16x80xbf16>
    %cst_11 = arith.constant dense<0.000000e+00> : vector<16x256xf32>
    %19 = tpu.matmul %18, %17, %cst_11 {dimension_numbers = #tpu.dot_dimension_numbers<[1], [0], [0], [1], [0, 0, 1, 1], [], []>} : vector<16x80xbf16>, vector<80x256xbf16>, vector<16x256xf32> -> vector<16x256xf32>
    %c0_12 = arith.constant 0 : index
    %c0_13 = arith.constant 0 : index
    %20 = vector.load %arg6[%c0_12, %c0_13] : memref<16x1xf32, #tpu.memory_space<vmem>>, vector<16x1xf32>
    %21 = vector.broadcast %20 : vector<16x1xf32> to vector<16x256xf32>
    %22 = arith.addf %19, %21 : vector<16x256xf32>
    %c0_14 = arith.constant 0 : index
    %c0_15 = arith.constant 0 : index
    %c0_16 = arith.constant 0 : index
    %23 = vector.load %arg7[%c0_14, %c0_15, %c0_16] : memref<1x16x256xbf16, #tpu.memory_space<vmem>>, vector<1x16x256xbf16>
    %24 = vector.shape_cast %23 : vector<1x16x256xbf16> to vector<16x256xbf16>
    %25 = arith.extf %24 : vector<16x256xbf16> to vector<16x256xf32>
    %26 = arith.addf %22, %25 : vector<16x256xf32>
    %c256_i32 = arith.constant 256 : i32
    %27 = arith.muli %arg1, %c256_i32 : i32
    %28 = tpu.iota {dimensions = array<i32: 1>} : vector<1x256xi32>
    %29 = vector.broadcast %27 : i32 to vector<1x256xi32>
    %30 = arith.addi %29, %28 : vector<1x256xi32>
    %c128_i32 = arith.constant 128 : i32
    %31 = vector.broadcast %c128_i32 : i32 to vector<1x256xi32>
    %32 = arith.cmpi sge, %30, %31 : vector<1x256xi32>
    %c428_i32 = arith.constant 428 : i32
    %33 = vector.broadcast %c428_i32 : i32 to vector<1x256xi32>
    %34 = arith.cmpi slt, %30, %33 : vector<1x256xi32>
    %35 = arith.andi %32, %34 : vector<1x256xi1>
    %cst_17 = arith.constant 0.000000e+00 : f32
    %36 = vector.shape_cast %35 : vector<1x256xi1> to vector<1x256xi1>
    %37 = vector.broadcast %36 : vector<1x256xi1> to vector<16x256xi1>
    %38 = vector.broadcast %cst_17 : f32 to vector<16x256xf32>
    %39 = arith.select %37, %26, %38 : vector<16x256xi1>, vector<16x256xf32>
    %40 = arith.truncf %39 : vector<16x256xf32> to vector<16x256xbf16>
    %c0_18 = arith.constant 0 : index
    %c0_19 = arith.constant 0 : index
    %c0_20 = arith.constant 0 : index
    %41 = vector.load %arg8[%c0_18, %c0_19, %c0_20] : memref<1x16x256xbf16, #tpu.memory_space<vmem>>, vector<1x16x256xbf16>
    %42 = vector.shape_cast %41 : vector<1x16x256xbf16> to vector<16x256xbf16>
    %43 = vector.shape_cast %40 : vector<16x256xbf16> to vector<1x16x256xbf16>
    tpu.vector_store %arg8[%c0_18, %c0_19, %c0_20], %43 {strides = array<i32>} : memref<1x16x256xbf16, #tpu.memory_space<vmem>>, vector<1x16x256xbf16>,
    return
  }
  func.func @transform_0(%arg0: i32, %arg1: i32) -> (i32, i32, i32) {
    %c2_i32 = arith.constant 2 : i32
    %0 = arith.muli %arg1, %c2_i32 : i32
    %c1_i32 = arith.constant 1 : i32
    %1 = arith.subi %0, %c1_i32 : i32
    %c0_i32 = arith.constant 0 : i32
    %2 = arith.maxsi %1, %c0_i32 : i32
    %c0_i32_0 = arith.constant 0 : i32
    %c0_i32_1 = arith.constant 0 : i32
    return %arg0, %c0_i32_0, %2 : i32, i32, i32
  }
  func.func @transform_1(%arg0: i32, %arg1: i32) -> (i32, i32, i32) {
    %c0_i32 = arith.constant 0 : i32
    %c0_i32_0 = arith.constant 0 : i32
    return %arg0, %c0_i32, %arg1 : i32, i32, i32
  }
  func.func @transform_2(%arg0: i32, %arg1: i32) -> (i32, i32, i32) {
    %c1_i32 = arith.constant 1 : i32
    %0 = arith.addi %arg1, %c1_i32 : i32
    %c2_i32 = arith.constant 2 : i32
    %1 = arith.muli %0, %c2_i32 : i32
    %c5_i32 = arith.constant 5 : i32
    %2 = arith.minsi %1, %c5_i32 : i32
    %c0_i32 = arith.constant 0 : i32
    %c0_i32_0 = arith.constant 0 : i32
    return %arg0, %c0_i32, %2 : i32, i32, i32
  }
  func.func @transform_3(%arg0: i32, %arg1: i32) -> (i32, i32) {
    %c0_i32 = arith.constant 0 : i32
    %c0_i32_0 = arith.constant 0 : i32
    %c0_i32_1 = arith.constant 0 : i32
    return %c0_i32, %c0_i32_0 : i32, i32
  }
  func.func @transform_4(%arg0: i32, %arg1: i32) -> (i32, i32) {
    %c0_i32 = arith.constant 0 : i32
    %c0_i32_0 = arith.constant 0 : i32
    %c0_i32_1 = arith.constant 0 : i32
    return %c0_i32, %c0_i32_0 : i32, i32
  }
  func.func @transform_5(%arg0: i32, %arg1: i32) -> (i32, i32, i32) {
    %c0_i32 = arith.constant 0 : i32
    %c0_i32_0 = arith.constant 0 : i32
    return %arg0, %c0_i32, %arg1 : i32, i32, i32
  }
  func.func @transform_6(%arg0: i32, %arg1: i32) -> (i32, i32, i32) {
    %c0_i32 = arith.constant 0 : i32
    %c0_i32_0 = arith.constant 0 : i32
    return %arg0, %c0_i32, %arg1 : i32, i32, i32
  }
}

</mosaic_0001>

<bundles_post_ra>
// kernel: tpu_custom_call.1
= control target key start
LH: loop header
LB: loop body
LE: loop exit
PB: predicated region body
PF: predicated region fallthrough
CT: control target
= control target key end

     0   :  { %s1996_s0 = inlined_call_operand.hbm [shape: bf16[2,16,768], index: 0, kind: input, shape index: {}]   ;;  %s1997_s1 = inlined_call_operand.hbm [shape: bf16[2,16,768], index: 1, kind: input, shape index: {}]   ;;  %s1998_s2 = inlined_call_operand.hbm [shape: bf16[2,16,768], index: 2, kind: input, shape index: {}]   ;;  %s1999_s3 = inlined_call_operand.vmem [shape: bf16[16,80], index: 3, kind: input, shape index: {}]   ;;  %s2000_s4 = inlined_call_operand.vmem [shape: f32[16,1], index: 4, kind: input, shape index: {}]   ;;  %s2001_s5 = inlined_call_operand.hbm [shape: bf16[2,16,768], index: 5, kind: input, shape index: {}]   ;;  %s2002_s6 = inlined_call_operand.hbm [shape: bf16[2,16,768], index: 6, kind: output, shape index: {}]  }
   0x1   :  { %2041 = sst [smem:[#allocation32_spill]] %s1996_s0 }
   0x2   :  { %2042 = sst [smem:[#allocation33_spill]] %s1997_s1 }
   0x3   :  { %2043 = sst [smem:[#allocation34_spill]] %s1998_s2 }
   0x4   :  { %2044 = sst [smem:[#allocation35_spill]] %s1999_s3 }
   0x5   :  { %2045 = sst [smem:[#allocation36_spill]] %s2000_s4 }
   0x6   :  { %2046 = sst [smem:[#allocation37_spill]] %s2001_s5 }
   0x7   :  { %2047 = sst [smem:[#allocation38_spill]] %s2002_s6 }
   0x8   :  { %11 = vsyncpa [#allocation3], 0 }
   0x9   :  { %13 = vsyncpa [#allocation3 + $0x1], 0 }
   0xa   :  { %14 = vsyncpa [#allocation6], 0 }
   0xb   :  { %16 = vsyncpa [#allocation6 + $0x1], 0 }
   0xc   :  { %17 = vsyncpa [#allocation9], 0 }
   0xd   :  { %19 = vsyncpa [#allocation9 + $0x1], 0 }
   0xe   :  { %20 = vsyncpa [#allocation4], 0 }
   0xf   :  { %22 = vsyncpa [#allocation4 + $0x1], 0  ;;  %s1423_s21 = smov 0   ;;  %s1425_s22 = smov 0  }
  0x10   :  { %s1427_s23 = smov 0   ;;  %s1429_s24 = smov 0  }
  0x11   :  { %s1431_s25 = smov 0   ;;  %s1433_s26 = smov 0  }
  0x12   :  { %s1435_s27 = smov 0   ;;  %s1437_s28 = smov 0  }
  0x13   :  { %s1439_s29 = smov 0   ;;  %s1441_s30 = smov 0  }
  0x14   :  { %s1443_s7 = smov 0   ;;  %s1445_s8 = smov 0  }
  0x15   :  { %s1447_s9 = smov 0   ;;  %s1449_s10 = smov 0  }
  0x16 LB: > { %2048 = sst [smem:[#allocation16_spill]] %s1327_s24  ;;  %s1494_s11 = sadd.s32 4294967295, %s1367_s10   ;;  %s1367_s10 = sphi %s1449_s10, %s28_s10   ;;  %s1363_s9 = sphi %s1447_s9, %s2144_s9   ;;  %s1359_s8 = sphi %s1445_s8, %s2134_s8   ;;  %s1355_s7 = sphi %s1443_s7, %s2133_s7   ;;  %s1351_s30 = sphi %s1441_s30, %s2132_s30   ;;  %s1347_s29 = sphi %s1439_s29, %s2143_s29   ;;  %s1343_s28 = sphi %s1437_s28, %s2142_s28   ;;  %s1339_s27 = sphi %s1435_s27, %s2131_s27   ;;  %s1335_s26 = sphi %s1433_s26, %s2141_s26   ;;  %s1331_s25 = sphi %s1431_s25, %s2140_s25   ;;  %s1327_s24 = sphi %s1429_s24, %s2130_s24   ;;  %s1323_s23 = sphi %s1427_s23, %s2139_s23   ;;  %s1319_s22 = sphi %s1425_s22, %s2138_s22   ;;  %s1315_s21 = sphi %s1423_s21, %s2137_s21  }
  0x17   : > { %2049 = sst [smem:[#allocation17_spill]] %s1331_s25  ;;  %s871_s12 = sadd.s32 4294967294, %s1367_s10  }
  0x18   : > { %2050 = sst [smem:[#allocation18_spill]] %s1343_s28  ;;  %s37_s13 = sadd.s32 1, %s1359_s8 }
  0x19   : > { %2051 = sst [smem:[#allocation19_spill]] %s1351_s30  ;;  %p1499_p0 = scmp.ge.s32.totalorder %s37_s13, 3 }
  0x1a   : > { %2052 = sst [smem:[#allocation20_spill]] %s1355_s7  ;;  %s1504_s16 = sshll.u32 %s1359_s8, 1 }
  0x1b   : > { %2053 = sst [smem:[#allocation21_spill]] %s1359_s8  ;;  %p2016_p1 = scmp.eq.s32.totalorder %s1367_s10, 0 }
  0x1c   : > { %2054 = sst [smem:[#allocation22_spill]] %s1363_s9  ;;  %p2015_p2 = scmp.eq.s32.totalorder %s1494_s11, 0 }
  0x1d   : > { %s2146_s13 = smov (%p1499_p0, %s37_s13), 0  ;;  %p92_p3 = scmp.ne.s32.totalorder %s1335_s26, %s1331_s25 }
  0x1e   : > { %2056 = sst [smem:[#allocation23_spill]] %s2146_s13  ;;  %p98_p4 = scmp.ne.s32.totalorder %s1331_s25, %s1327_s24 }
  0x1f   : > { %p1521_p5 = por %p92_p3, %p2016_p1  ;;  %s2005_s20 = sadd.s32 2, %s1504_s16 }
  0x20   : > { %p1528_p6 = por %p98_p4, %p2015_p2  ;;  %p1534_p7 = scmp.lt.s32.totalorder %s2005_s20, 5 }
  0x21   : > { %p230_p8 = scmp.eq.s32.totalorder %s1494_s11, 5  ;;  %p236_p9 = scmp.eq.s32.totalorder %s871_s12, 5 }
  0x22   : > { %s2058_s14 = scalar_select %p1528_p6, 1, 0 }
  0x23   : > { %s2060_s6 = scalar_select %p1534_p7, 1, 0 }
  0x24   : > { %2059 = sst [smem:[#allocation24_spill]] %s2058_s14  ;;  %p2019_p10 = scmp.lt.s32.totalorder %s1367_s10, 6 }
  0x25   : > { %p1540_p11 = por %p230_p8, %p92_p3  ;;  %p1544_p12 = por %p236_p9, %p98_p4 }
  0x26   : > { %s1549_s24 = smul.u32 12, %s1363_s9  ;;  %s288_s20 = sand.u32 1, %s1367_s10  }
  0x27   : > { %s2061_s17 = scalar_select %p1540_p11, 1, 0 }
  0x28   : > { %s2063_s18 = scalar_select %p1544_p12, 1, 0 }
  0x29   : > { %2062 = sst [smem:[#allocation25_spill]] %s2061_s17  ;;  %s2014_s3 = sand.u32 1, %s1335_s26  }
  0x2a   : > { %2064 = sst [smem:[#allocation26_spill]] %s2063_s18  ;;  %s1555_s7 = sshll.u32 %s2014_s3, 4 }
  0x2b   : > { %2065 = sst [smem:[#allocation27_spill]] %s1555_s7  ;;  %s298_s12 = sadd.s32 %s1549_s24, %s1504_s16 }
  0x2c   : > { %s1559_s30 = sshll.u32 %s298_s12, 6  ;;  %s292_s4 = scalar_lea.vmem [#allocation5], %s1555_s7 }
  0x2d   : > { %s301_s14 = sshll.u32 %s292_s4, 4  ;;  %s2066_s1 = sld [smem:[#allocation33_spill]]  ;;  %s1568_s14 = int_to_ptr.vmem [resolvable:$true] %s301_s14 }
  0x2e   : > { %p1574_p13 = pnand %p2019_p10, %p1521_p5  ;;  %s1580_s4 = scalar_lea.sflag [#allocation6], %s288_s20 }
  0x2f   : > { %2069 = sst [smem:[#allocation29_spill]] %s1580_s4 }
  0x30   : > { %s2067_s3 = scalar_select %p1574_p13, 1, 0 }
  0x31   : > { %p2036_p9 = pneg %p1574_p13 }
  0x32   : > { %2068 = sst [smem:[#allocation28_spill]] %s2067_s3 }
  0x33   : > { %s1566_s5 = scalar_lea.hbm %s2066_s1, %s1559_s30  ;;  %s1094_s12 = scalar_lea.hbm %s2066_s1, 1536 }
  0x34   : > { %s1089_s25 = scalar_lea.hbm %s1566_s5, 256  ;;  %p1095_p5 = scmp.lt.u32.totalorder %s1566_s5, %s2066_s1 }
  0x35   : > { %p1090_p8 = scmp.ne.s32.totalorder %s1566_s5, %s1089_s25  ;;  %p1096_p10 = scmp.lt.u32.totalorder %s1094_s12, %s1089_s25 }
  0x36   : > { %p1098_p4 = scmp.lt.u32.totalorder %s1089_s25, %s1566_s5 }
  0x37   : > { %p1092_p2 = pnand %p2036_p9, %p1090_p8  ;;  %p1097_p3 = por %p1096_p10, %p1095_p5 }
  0x39   : > { %p1093_p1 = pneg %p1092_p2  ;;  %p1099_p12 = por %p1098_p4, %p1097_p3 }
  0x3b   : > { %p1100_p11 = pnand %p1099_p12, %p1093_p1 }
  0x3d   : > { %1103 = shalt.err (!%p1100_p11)
}
  0x3e   : > { %s1104_s20 = scalar_lea.vmem %s1568_s14, 256  ;;  %s1369_s17 = smov [#allocation5]  }
  0x3f   : > { %p1105_p2 = scmp.ne.s32.totalorder %s1568_s14, %s1104_s20  ;;  %s1109_s19 = sshll.u32 %s1369_s17, 4  ;;  %s1110_s19 = int_to_ptr.vmem [resolvable:$false] %s1109_s19 }
  0x40   : > { %s1111_s7 = scalar_lea.vmem %s1110_s19, 512  ;;  %p1112_p7 = scmp.lt.s32.totalorder %s1568_s14, %s1110_s19 }
  0x41   : > { %p1107_p8 = pnand %p1105_p2, %p2036_p9  ;;  %p1113_p10 = scmp.lt.s32.totalorder %s1111_s7, %s1104_s20 }
  0x43   : > { %p1108_p6 = pneg %p1107_p8  ;;  %p1114_p5 = por %p1113_p10, %p1112_p7 }
  0x45   : > { %p1115_p3 = pnand %p1114_p5, %p1108_p6 }
  0x47   : > { %1118 = shalt.err (!%p1115_p3)
}
  0x48   : > { %s2024_s18 = smov 384   ;;  %s2022_s25 = smov 128  }
  0x49   : > { %s2023_s12 = smov 8   ;;  %p2070_p1 = scmp.lt.s32.totalorder %s1367_s10, 7 }
  0x4a   : > { %942 = dma.hbm_to_vmem [thread:$0]  (!%p1574_p13), %s1566_s5, 256, %s1568_s14, %s1580_s4, %s2024_s18, %s2022_s25, %s2023_s12  }
  0x4b   : > { %p2071_p6 = scmp.ge.s32.totalorder %s1367_s10, 1  ;;  %s873_s17 = sadd.s32 4294967295, %s1504_s16 }
  0x4c   : > { %s2074_s19 = sadd.s32 1, %s1363_s9  ;;  %p46_p11 = scmp.gt.s32.totalorder %s873_s17, 0 }
  0x4d   : > { %p1615_p7 = pnand %p2071_p6, %p2070_p1  ;;  %s2148_s19 = smov (!%p1499_p0, %s2074_s19), %s1363_s9 }
  0x4e   : > { %s874_s7 = sshll.u32 %s2146_s13, 1  ;;  %p42_p12 = scmp.ge.s32.totalorder %s2148_s19, 2 }
  0x4f   : > { %s2072_s20 = scalar_select %p1615_p7, 1, 0 }
  0x50   : > { %s875_s1 = sadd.s32 4294967295, %s874_s7  ;;  %s2150_s17 = smov (!%p46_p11, %s873_s17), 0 }
  0x51   : > { %2073 = sst [smem:[#allocation30_spill]] %s2072_s20  ;;  %s2152_s19 = smov (%p42_p12, %s2148_s19), 0 }
  0x52   : > { %2075 = sst [smem:[#allocation31_spill]] %s2152_s19  ;;  %p50_p4 = scmp.gt.s32.totalorder %s875_s1, 0 }
  0x53   : > { %s57_s5 = sadd.s32 1, %s1347_s29  ;;  %s1631_s14 = ssub.s32 %s1363_s9, %s2152_s19 }
  0x54   : > { %p64_p0 = scmp.ne.s32.totalorder %s1347_s29, %s1343_s28  ;;  %s2154_s1 = smov (!%p50_p4, %s875_s1), 0 }
  0x55   : > { %p2076_p2 = scmp.eq.s32.totalorder %s1367_s10, 0  ;;  %p70_p10 = scmp.ne.s32.totalorder %s1343_s28, %s1339_s27 }
  0x56   : > { %s53_s25 = ssub.s32 %s2150_s17, %s2154_s1  ;;  %s2078_s12 = ssub.s32 %s1359_s8, %s2146_s13 }
  0x57   : > { %p1637_p8 = por %p2076_p2, %p64_p0  ;;  %s82_s18 = sor.u32 %s2078_s12, %s1631_s14 }
  0x58   : > { %s54_s20 = sor.u32 %s53_s25, %s1631_s14  ;;  %p2079_p5 = scmp.eq.s32.totalorder %s1494_s11, 0 }
  0x59   : > { %p55_p1 = scmp.eq.s32.totalorder %s54_s20, 0  ;;  %p83_p6 = scmp.eq.s32.totalorder %s82_s18, 0 }
  0x5a   : > { %p1650_p3 = por %p2079_p5, %p70_p10  ;;  %s1654_s9 = sadd.s32 2, %s874_s7 }
  0x5b   : > { %s262_s3 = sand.u32 1, %s1347_s29   ;;  %s2081_s27 = sadd.s32 1, %s1335_s26 }
  0x5c   : > { %s2080_s19 = scalar_select %p1650_p3, 1, 0 }
  0x5d   : > { %s1658_s4 = scalar_select %p55_p1, %s1347_s29, %s57_s5  }
  0x5e   : > { %s1663_s1 = scalar_select %p83_p6, %s1335_s26, %s2081_s27  }
  0x5f   : > { %s880_s25 = sshll.u32 %s262_s3, 3  ;;  %s275_s12 = sadd.s32 %s1549_s24, %s2150_s17 }
  0x60   : > { %s883_s13 = sshll.u32 %s275_s12, 6  ;;  %s2082_s0 = sld [smem:[#allocation32_spill]] }
  0x61   : > { %s266_s18 = scalar_lea.vmem [#allocation2], %s880_s25  ;;  %p2083_p12 = scmp.lt.s32.totalorder %s1367_s10, 6 }
  0x62   : > { %s278_s20 = sshll.u32 %s266_s18, 4  ;;  %s1682_s17 = scalar_lea.sflag [#allocation3], %s262_s3  ;;  %s1672_s20 = int_to_ptr.vmem [resolvable:$true] %s278_s20 }
  0x63   : > { %p1678_p4 = pnand %p2083_p12, %p1637_p8 }
  0x65   : > { %p1121_p2 = pneg %p1678_p4 }
  0x66   : > { %s1670_s2 = scalar_lea.hbm %s2082_s0, %s883_s13  ;;  %s1124_s5 = scalar_lea.hbm %s2082_s0, 1536 }
  0x67   : > { %s1119_s28 = scalar_lea.hbm %s1670_s2, 128  ;;  %p1125_p8 = scmp.lt.u32.totalorder %s1670_s2, %s2082_s0 }
  0x68   : > { %p1120_p0 = scmp.ne.s32.totalorder %s1670_s2, %s1119_s28  ;;  %p1126_p1 = scmp.lt.u32.totalorder %s1124_s5, %s1119_s28 }
  0x69   : > { %p1128_p12 = scmp.lt.u32.totalorder %s1119_s28, %s1670_s2 }
  0x6a   : > { %p1122_p10 = pnand %p1121_p2, %p1120_p0  ;;  %p1127_p6 = por %p1126_p1, %p1125_p8 }
  0x6c   : > { %p1123_p5 = pneg %p1122_p10  ;;  %p1129_p9 = por %p1128_p12, %p1127_p6 }
  0x6e   : > { %p1130_p11 = pnand %p1129_p9, %p1123_p5 }
  0x70   : > { %1133 = shalt.err (!%p1130_p11)
}
  0x71   : > { %s1134_s3 = scalar_lea.vmem %s1672_s20, 128  ;;  %s1373_s25 = smov [#allocation2]  }
  0x72   : > { %p1135_p0 = scmp.ne.s32.totalorder %s1672_s20, %s1134_s3  ;;  %s1139_s12 = sshll.u32 %s1373_s25, 4  ;;  %s1140_s12 = int_to_ptr.vmem [resolvable:$false] %s1139_s12 }
  0x73   : > { %s1141_s18 = scalar_lea.vmem %s1140_s12, 256  ;;  %p1142_p7 = scmp.lt.s32.totalorder %s1672_s20, %s1140_s12 }
  0x74   : > { %p1137_p10 = pnand %p1135_p0, %p1121_p2  ;;  %p1143_p8 = scmp.lt.s32.totalorder %s1141_s18, %s1134_s3 }
  0x76   : > { %p1138_p3 = pneg %p1137_p10  ;;  %p1144_p1 = por %p1143_p8, %p1142_p7 }
  0x78   : > { %p1145_p6 = pnand %p1144_p1, %p1138_p3 }
  0x7a   : > { %1148 = shalt.err (!%p1145_p6)
}
  0x7b   : > { %s2038_s28 = smov 64   ;;  %s1375_s8 = smov 4  }
  0x7c   : > { %s2085_s13 = smov 384   ;;  %s121_s5 = sadd.s32 1, %s1323_s23 }
  0x7d   : > { %939 = dma.hbm_to_vmem [thread:$0]  (!%p1678_p4), %s1670_s2, 128, %s1672_s20, %s1682_s17, %s2085_s13, %s2038_s28, %s1375_s8  }
  0x7e   : > { %s2086_s15 = sadd.s32 2, %s1504_s16  ;;  %p2087_p9 = scmp.ne.s32.totalorder %s2060_s6, 0 }
  0x7f   : > { %p2088_p7 = scmp.lt.s32.totalorder %s1654_s9, 5  ;;  %p128_p3 = scmp.ne.s32.totalorder %s1323_s23, %s1319_s22 }
  0x80   : > { %s2156_s15 = smov (!%p2087_p9, %s2086_s15), 5  ;;  %p134_p11 = scmp.ne.s32.totalorder %s1319_s22, %s1315_s21 }
  0x81   : > { %s2158_s9 = smov (!%p2088_p7, %s1654_s9), 5  ;;  %s313_s3 = sand.u32 1, %s1323_s23  }
  0x82   : > { %s117_s27 = ssub.s32 %s2156_s15, %s2158_s9  ;;  %p2089_p2 = scmp.eq.s32.totalorder %s1367_s10, 0 }
  0x83   : > { %s118_s25 = sor.u32 %s117_s27, %s1631_s14  ;;  %p2090_p0 = scmp.eq.s32.totalorder %s1494_s11, 0 }
  0x84   : > { %p130_p5 = por %p128_p3, %p2089_p2  ;;  %p119_p12 = scmp.eq.s32.totalorder %s118_s25, 0 }
  0x85   : > { %p1731_p10 = por %p134_p11, %p2090_p0  ;;  %s887_s2 = sshll.u32 %s313_s3, 3 }
  0x86   : > { %s324_s6 = sadd.s32 %s1549_s24, %s2156_s15  ;;  %s2092_s21 = sld [smem:[#allocation34_spill]] }
  0x87   : > { %s2091_s7 = scalar_select %p1731_p10, 1, 0 }
  0x88   : > { %s1737_s16 = scalar_select %p119_p12, %s1323_s23, %s121_s5  }
  0x89   : > { %s889_s20 = sshll.u32 %s324_s6, 6  ;;  %s315_s9 = scalar_lea.vmem [#allocation7], %s887_s2 }
  0x8a   : > { %s327_s14 = sshll.u32 %s315_s9, 4  ;;  %p2094_p4 = scmp.lt.s32.totalorder %s1367_s10, 6  ;;  %s1744_s14 = int_to_ptr.vmem [resolvable:$true] %s327_s14 }
  0x8b   : > { %s2096_s15 = sld [smem:[#allocation37_spill]] }
  0x8c   : > { %s2093_s18 = smov %s2092_s21  ;;  %s1742_s28 = scalar_lea.hbm %s2092_s21, %s889_s20 }
  0x8d   : > { %p1748_p8 = pnand %p2094_p4, %p130_p5  ;;  %s1149_s25 = scalar_lea.hbm %s1742_s28, 128 }
  0x8e   : > { %p1150_p1 = scmp.ne.s32.totalorder %s1742_s28, %s1149_s25  ;;  %s1154_s20 = scalar_lea.hbm %s2093_s18, 1536 }
  0x8f   : > { %p1151_p6 = pneg %p1748_p8  ;;  %p1155_p3 = scmp.lt.u32.totalorder %s1742_s28, %s2093_s18 }
  0x90   : > { %p1156_p11 = scmp.lt.u32.totalorder %s1154_s20, %s1149_s25  ;;  %p1158_p5 = scmp.lt.u32.totalorder %s1149_s25, %s1742_s28 }
  0x91   : > { %s1756_s3 = scalar_lea.hbm %s2096_s15, %s1559_s30  ;;  %p1152_p9 = pnand %p1151_p6, %p1150_p1 }
  0x92   : > { %p1157_p2 = por %p1156_p11, %p1155_p3 }
  0x93   : > { %p1153_p7 = pneg %p1152_p9 }
  0x94   : > { %p1159_p12 = por %p1158_p5, %p1157_p2 }
  0x96   : > { %p1160_p0 = pnand %p1159_p12, %p1153_p7 }
  0x98   : > { %1163 = shalt.err (!%p1160_p0)
}
  0x99   : > { %s1164_s30 = scalar_lea.vmem %s1744_s14, 128  ;;  %s1376_s21 = smov [#allocation7]  }
  0x9a   : > { %p1165_p4 = scmp.ne.s32.totalorder %s1744_s14, %s1164_s30  ;;  %s1169_s9 = sshll.u32 %s1376_s21, 4  ;;  %s1170_s9 = int_to_ptr.vmem [resolvable:$false] %s1169_s9 }
  0x9b   : > { %s1171_s24 = scalar_lea.vmem %s1170_s9, 256  ;;  %p1172_p10 = scmp.lt.s32.totalorder %s1744_s14, %s1170_s9 }
  0x9c   : > { %p1167_p1 = pnand %p1165_p4, %p1151_p6  ;;  %p1173_p3 = scmp.lt.s32.totalorder %s1171_s24, %s1164_s30 }
  0x9e   : > { %p1168_p9 = pneg %p1167_p1  ;;  %p1174_p11 = por %p1173_p3, %p1172_p10 }
  0xa0   : > { %p1175_p2 = pnand %p1174_p11, %p1168_p9 }
  0xa2   : > { %1178 = shalt.err (!%p1175_p2)
}
  0xa3   : > { %s2097_s5 = smov 64   ;;  %s2098_s25 = sld [smem:[#allocation29_spill]] }
  0xa4   : > { %s2099_s2 = sld [smem:[#allocation27_spill]]  ;;  %s2101_s12 = sand.u32 1, %s1335_s26  }
  0xa5   : > { %s1792_s27 = scalar_lea.sflag [#allocation9], %s2101_s12  ;;  %s1179_s30 = scalar_lea.hbm %s1756_s3, 256 }
  0xa6   : > { %p1180_p10 = scmp.ne.s32.totalorder %s1756_s3, %s1179_s30  ;;  %p2102_p6 = pneg %p1574_p13 }
  0xa7   : > { %s1184_s24 = scalar_lea.hbm %s2096_s15, 1536  ;;  %p1188_p4 = scmp.lt.u32.totalorder %s1179_s30, %s1756_s3 }
  0xa8   : > { %p1182_p7 = pnand %p1180_p10, %p2102_p6  ;;  %p1186_p12 = scmp.lt.u32.totalorder %s1184_s24, %s1179_s30 }
  0xa9   : > { %945 = dma.hbm_to_vmem [thread:$0]  (!%p1748_p8), %s1742_s28, 128, %s1744_s14, %s2098_s25, %s2085_s13, %s2097_s5, %s1375_s8  }
  0xaa   : > { %s341_s20 = scalar_lea.vmem [#allocation8], %s2099_s2  ;;  %p1183_p5 = pneg %p1182_p7 }
  0xab   : > { %s350_s17 = sshll.u32 %s341_s20, 4  ;;  %p1185_p8 = scmp.lt.u32.totalorder %s1756_s3, %s2096_s15  ;;  %s1788_s17 = int_to_ptr.vmem [resolvable:$true] %s350_s17 }
  0xad   : > { %p1187_p0 = por %p1186_p12, %p1185_p8 }
  0xaf   : > { %p1189_p1 = por %p1188_p4, %p1187_p0 }
  0xb1   : > { %p1190_p9 = pnand %p1189_p1, %p1183_p5 }
  0xb3   : > { %1193 = shalt.err (!%p1190_p9)
}
  0xb4   : > { %s1194_s28 = scalar_lea.vmem %s1788_s17, 256  ;;  %p2103_p11 = pmov %p2102_p6 }
  0xb5   : > { %p1195_p3 = scmp.ne.s32.totalorder %s1788_s17, %s1194_s28  ;;  %s1377_s8 = smov [#allocation8]  }
  0xb6   : > { %s1199_s14 = sshll.u32 %s1377_s8, 4  ;;  %s1200_s14 = int_to_ptr.vmem [resolvable:$false] %s1199_s14 }
  0xb7   : > { %p1197_p2 = pnand %p1195_p3, %p2103_p11  ;;  %s1201_s0 = scalar_lea.vmem %s1200_s14, 512 }
  0xb8   : > { %p1202_p6 = scmp.lt.s32.totalorder %s1788_s17, %s1200_s14  ;;  %p1203_p7 = scmp.lt.s32.totalorder %s1201_s0, %s1194_s28 }
  0xb9   : > { %p1198_p10 = pneg %p1197_p2 }
  0xba   : > { %p1204_p8 = por %p1203_p7, %p1202_p6 }
  0xbc   : > { %p1205_p12 = pnand %p1204_p8, %p1198_p10 }
  0xbe   : > { %1208 = shalt.err (!%p1205_p12)
}
  0xbf   : > { %s2104_s18 = smov 8   ;;  %s2105_s5 = smov 128  }
  0xc0   : > { %948 = dma.hbm_to_vmem [thread:$0]  (!%p1574_p13), %s1756_s3, 256, %s1788_s17, %s1792_s27, %s2085_s13, %s2105_s5, %s2104_s18  }
  0xc1   : > { %s2106_s25 = sld [smem:[#allocation30_spill]] }
  0xc7   : > { %p2107_p5 = scmp.ne.s32.totalorder %s2106_s25, 0 }
  0xc8   : > { %s2108_s2 = sld [smem:[#allocation18_spill]] (!%p2107_p5)  ;;  %p2109_p0 = scmp.ne.s32.totalorder (!%p2107_p5), %s2080_s19, 0 }
  0xc9   : > { %362 = sbr.rel (%p2107_p5) target bundleno = 731 (0x2db), region = 44 }
  0xce   : > { %s364_s20 = sand.u32 (!%p2107_p5), 1, %s2108_s2  }
  0xcf   : > { %s894_s12 = sshll.u32 (!%p2107_p5), %s364_s20, 3  ;;  %s365_s30 = scalar_lea.sflag (!%p2107_p5), [#allocation3], %s364_s20 }
  0xd0   : > { %s368_s21 = scalar_lea.vmem [#allocation2], %s894_s12 }
  0xd1   : > { %1294 = dma.done.wait (%p2109_p0), %s365_s30, 128  }
  0xd2   : > { %1296 = vsyncadd (%p2109_p0), %s365_s30, 4294967168  ;;  %s2110_s6 = sld [smem:[#allocation17_spill]]  ;;  %s2111_s9 = sld [smem:[#allocation24_spill]] }
  0xd3   : > { %s373_s24 = sand.u32 1, %s1494_s11  }
  0xd4   : > { %s374_s3 = scalar_lea.sflag [#allocation6], %s373_s24 }
  0xd8   : > { %s1830_s28 = sand.u32 1, %s2110_s6   ;;  %p2112_p13 = scmp.ne.s32.totalorder %s2111_s9, 0 }
  0xd9   : > { %s1833_s13 = sshll.u32 %s1830_s28, 4 }
  0xda   : > { %s377_s17 = scalar_lea.vmem [#allocation5], %s1833_s13 }
  0xdb   : > { %1298 = dma.done.wait (%p2112_p13), %s374_s3, 256  }
  0xdc   : > { %1300 = vsyncadd (%p2112_p13), %s374_s3, 4294967040  ;;  %s384_s19 = sand.u32 1, %s1319_s22   ;;  %p2113_p4 = scmp.ne.s32.totalorder %s2091_s7, 0 }
  0xdd   : > { %s896_s27 = sshll.u32 %s384_s19, 3 }
  0xde   : > { %s386_s8 = scalar_lea.vmem [#allocation7], %s896_s27 }
  0xdf   : > { %1302 = dma.done.wait (%p2113_p4), %s374_s3, 128  }
  0xe0   : > { %1304 = vsyncadd (%p2113_p4), %s374_s3, 4294967168  ;;  %s392_s11 = scalar_lea.sflag [#allocation9], %s1830_s28  ;;  %s395_s14 = scalar_lea.vmem [#allocation8], %s1833_s13 }
  0xe1   : > { %1306 = dma.done.wait (%p2112_p13), %s392_s11, 256  }
  0xe2   : > { %1308 = vsyncadd (%p2112_p13), %s392_s11, 4294967040  ;;  %v1083_v0 = vld [vmem:[%s377_s17] ss:$8 sps:$4 sm:$0xff]   ;;  %v1086_v3 = vld [vmem:[%s377_s17 + $0x4] ss:$8 sps:$4 sm:$0xff]   ;;  %s1378_s7 = smov 125   ;;  %v657_v59 = vlaneseq }
  0xe3   : > { %v1085_v1 = vld [vmem:[%s368_s21] sm:$0xff]   ;;  %vm481_vm0 = vcmp.gt.bf16.partialorder %v1083_v0, 0  ;;  %v485_v2 = vmul.bf16 1036860877, %v1083_v0  ;;  %vm482_vm2 = vcmp.gt.bf16.partialorder %v1086_v3, 0  ;;  %v1087_v9 = vld [vmem:[%s386_s8] sm:$0xff]  }
  0xe4   : > { %vm480_vm1 = vcmp.gt.bf16.partialorder %v1085_v1, 0  ;;  %v484_v4 = vmul.bf16 1036860877, %v1085_v1  ;;  %v486_v6 = vmul.bf16 1036860877, %v1086_v3  ;;  %s1379_s0 = smov 122  }
  0xe5   : > { %v489_v5 = vsel %vm481_vm0, %v1083_v0, %v485_v2  ;;  %v487_v10 = vmul.bf16 1036860877, %v1087_v9  ;;  %vm483_vm3 = vcmp.gt.bf16.partialorder %v1087_v9, 0  ;;  %s1380_s18 = smov 119   ;;  %s1381_s5 = smov 116   ;;  %vm508_vm4 = vcmask 998400  }
  0xe6   : > { %497 = vrot.lane.b32.xlu0 %v489_v5, %s1378_s7  ;;  %v488_v7 = vsel %vm480_vm1, %v1085_v1, %v484_v4  ;;  %v490_v8 = vsel %vm482_vm2, %v1086_v3, %v486_v6  ;;  %s1382_s25 = smov 6   ;;  %vm501_vm5 = vcmask 1022976   ;;  %vm517_vm6 = vcmask 973824   ;;  %s2114_s12 = sld [smem:[#allocation36_spill]]  ;;  %v646_v0 = vld [vmem:[%s395_s14] sm:$0xff]  ;;  %v647_v3 = vld [vmem:[%s395_s14 + $0x8] sm:$0xff] }
  0xe7   : > { %495 = vrot.lane.b32.xlu1 %v488_v7, %s1378_s7  ;;  %v491_v11 = vsel %vm483_vm3, %v1087_v9, %v487_v10  ;;  %vm526_vm7 = vcmask 949248   ;;  %v1383_v27 = vmov 0   ;;  %vm578_vm8 = vcmask 48128   ;;  %s2115_s6 = sld [smem:[#allocation19_spill]]  ;;  %s2116_s9 = sld [smem:[#allocation20_spill]] }
  0xe8   : > { %635 = vmatprep.mubr.bf16.mxu0 %v1383_v27  ;;  %1081 = vset.pattern.permute.xlu0 %v1383_v27  ;;  %s2117_s17 = sld [smem:[#allocation35_spill]]  ;;  %vm599_vm9 = vcmask 654336   ;;  %v658_v60 = vand.u32 127, %v657_v59  ;;  %v648_v4 = vunpack.c.l.bf16 %v646_v0  ;;  %v649_v6 = vunpack.c.h.bf16 %v646_v0  ;;  %s438_s14 = scalar_lea.vmem [#allocation10], %s1833_s13 }
  0xe9   : > { %1082 = vset.pattern.permute.xlu1 %v1383_v27  ;;  %v650_v10 = vunpack.c.l.bf16 %v647_v3  ;;  %s692_s30 = scalar_lea.sflag [#allocation4], %s1830_s28 }
  0xea   : > { %499 = vrot.lane.b32.xlu0 %v490_v8, %s1378_s7  ;;  %v659_v62 = vadd.s32 128, %v658_v60  ;;  %s707_s7 = sshll.u32 %s438_s14, 4  ;;  %s1909_s7 = int_to_ptr.vmem [resolvable:$true] %s707_s7 }
  0xeb   : > { %504 = vrot.lane.b32.xlu1 %v489_v5, %s1379_s0  ;;  %s1209_s21 = scalar_lea.vmem %s1909_s7, 256 }
  0xec   : > { %v532_v35 = vld [vmem:[%s2114_s12 + $0x8] sm:$0xff]  ;;  %v531_v37 = vld [vmem:[%s2114_s12] sm:$0xff]  ;;  %p1210_p1 = scmp.ne.s32.totalorder %s1909_s7, %s1209_s21 }
  0xed   : > { %s905_s19 = sshll.u32 %s2115_s6, 8  ;;  %s925_s27 = smul.u32 12, %s2116_s9 }
  0xee   : > { %506 = vrot.lane.b32.xlu0 %v490_v8, %s1379_s0  ;;  %v1088_v58 = vld [vmem:[%s2117_s17] sm:$0xff]   ;;  %v660_v61 = vstv %s905_s19  ;;  %s909_s8 = sshll.u32 %s2115_s6, 1  ;;  %s2122_s0 = sld [smem:[#allocation25_spill]] }
  0xef   : > { %511 = vrot.lane.b32.xlu1 %v489_v5, %s1380_s18  ;;  %v661_v63 = vadd.s32 %v660_v61, %v658_v60  ;;  %v662_v1 = vadd.s32 %v660_v61, %v659_v62  ;;  %s704_s11 = sadd.s32 %s925_s27, %s909_s8  ;;  %s1384_s6 = smov [#allocation10]  }
  0xf0   : > { %s1213_s9 = sshll.u32 %s1384_s6, 4  ;;  %s1214_s9 = int_to_ptr.vmem [resolvable:$false] %s1213_s9 }
  0xf1   : > { %vm663_vm10 = vcmp.ge.s32.totalorder %v661_v63, 128  ;;  %vm665_vm11 = vcmp.lt.s32.totalorder %v661_v63, 428  ;;  %vm664_vm12 = vcmp.ge.s32.totalorder %v662_v1, 128  ;;  %vm666_vm13 = vcmp.lt.s32.totalorder %v662_v1, 428  ;;  %s1215_s24 = scalar_lea.vmem %s1214_s9, 512  ;;  %p1216_p2 = scmp.lt.s32.totalorder %s1909_s7, %s1214_s9 }
  0xf2   : > { %513 = vrot.lane.b32.xlu0 %v490_v8, %s1380_s18  ;;  %vm1896_vm14 = vmand %vm663_vm10, %vm665_vm11  ;;  %p1217_p10 = scmp.lt.s32.totalorder %s1215_s24, %s1209_s21 }
  0xf3   : > { %515 = vrot.lane.b32.xlu1 %v491_v11, %s1380_s18  ;;  %vm1900_vm15 = vmand %vm664_vm12, %vm666_vm13  ;;  %s910_s18 = sshll.u32 %s704_s11, 6 }
  0xf4   : > { %p2125_p9 = scmp.ne.s32.totalorder %s2122_s0, 0  ;;  %p1218_p6 = por %p1217_p10, %p1216_p2 }
  0xf6   : > { %520 = vrot.lane.b32.xlu0 %v489_v5, %s1381_s5  ;;  %p1211_p3 = pnand %p1210_p1, %p2125_p9 }
  0xf7   : > { %522 = vrot.lane.b32.xlu1 %v490_v8, %s1381_s5 }
  0xf8   : > { %p1212_p11 = pneg %p1211_p3 }
  0xfa   : > { %524 = vrot.lane.b32.xlu0 %v491_v11, %s1381_s5  ;;  %p1219_p7 = pnand %p1218_p6, %p1212_p11 }
  0xfb   : > { %550 = vrot.lane.b32.xlu1 %v489_v5, %s1382_s25 }
  0xfe   : > { %552 = vrot.lane.b32.xlu0 %v490_v8, %s1382_s25 }
  0xff   : > { %548 = vrot.lane.b32.xlu1 %v488_v7, %s1382_s25 }
 0x158   : > { %v498_v12 = vpop.permute.xlu0 %497 }
 0x159   : > { %v496_v13 = vpop.permute.xlu1 %495 }
 0x15a   : > { %v502_v23 = vsel %vm501_vm5, %v496_v13, %v498_v12 }
 0x15c   : > { %v500_v14 = vpop.permute.xlu0 %499 }
 0x15d   : > { %558 = vrot.lane.b32.xlu1 %v500_v14, %s1382_s25  ;;  %v505_v15 = vpop.permute.xlu1 %504  ;;  %v503_v18 = vsel %vm501_vm5, %v498_v12, %v500_v14  ;;  %v651_v14 = vunpack.c.h.bf16 %v647_v3 }
 0x160   : > { %v507_v16 = vpop.permute.xlu0 %506 }
 0x161   : > { %564 = vrot.lane.b32.xlu0 %v507_v16, %s1382_s25  ;;  %560 = vrot.lane.b32.xlu1 %v505_v15, %s1382_s25  ;;  %v512_v17 = vpop.permute.xlu1 %511  ;;  %v509_v19 = vsel %vm508_vm4, %v505_v15, %v507_v16 }
 0x164   : > { %v514_v20 = vpop.permute.xlu0 %513 }
 0x165   : > { %556 = vrot.lane.b32.xlu0 %v503_v18, %s1382_s25  ;;  %562 = vrot.lane.b32.xlu1 %v509_v19, %s1382_s25  ;;  %v516_v21 = vpop.permute.xlu1 %515  ;;  %v518_v30 = vsel %vm517_vm6, %v512_v17, %v514_v20 }
 0x166   : > { %v519_v22 = vsel %vm517_vm6, %v514_v20, %v516_v21 }
 0x168   : > { %v521_v24 = vpop.permute.xlu0 %520 }
 0x169   : > { %554 = vrot.lane.b32.xlu0 %v502_v23, %s1382_s25  ;;  %570 = vrot.lane.b32.xlu1 %v519_v22, %s1382_s25  ;;  %v523_v25 = vpop.permute.xlu1 %522 }
 0x16a   : > { %v527_v26 = vsel %vm526_vm7, %v521_v24, %v523_v25 }
 0x16c   : > { %v525_v28 = vpop.permute.xlu0 %524 }
 0x16d   : > { %566 = vrot.lane.b32.xlu0 %v512_v17, %s1382_s25  ;;  %574 = vrot.lane.b32.xlu1 %v527_v26, %s1382_s25  ;;  %v551_v29 = vpop.permute.xlu1 %550  ;;  %v528_v36 = vsel %vm526_vm7, %v523_v25, %v525_v28 }
 0x170   : > { %v553_v31 = vpop.permute.xlu0 %552 }
 0x171   : > { %568 = vrot.lane.b32.xlu0 %v518_v30, %s1382_s25  ;;  %572 = vrot.lane.b32.xlu1 %v521_v24, %s1382_s25  ;;  %v549_v32 = vpop.permute.xlu1 %548  ;;  %v580_v33 = vsel %vm578_vm8, %v551_v29, %v553_v31 }
 0x172   : > { %603 = vmatprep.subr.bf16.mxu0 %v580_v33  ;;  %v579_v34 = vsel %vm578_vm8, %v549_v32, %v551_v29 }
 0x173   : > { %604 = vmatpush1.bf16.msra.mxu0 %v579_v34 }
 0x175   : > { %576 = vrot.lane.b32.xlu0 %v528_v36, %s1382_s25  ;;  %540 = vperm.xlu1 %1082, %v532_v35   ;;  %s2123_s25 = sld [smem:[#allocation38_spill]] }
 0x179   : > { %535 = vperm.xlu0 %1081, %v531_v37  }
 0x17b   : > { %s2124_s2 = smov %s2123_s25  ;;  %s1918_s20 = scalar_lea.hbm %s2123_s25, %s910_s18 }
 0x1cf   : > { %v559_v38 = vpop.permute.xlu1 %558 }
 0x1d3   : > { %v565_v39 = vpop.permute.xlu0 %564  ;;  %v561_v40 = vpop.permute.xlu1 %560 }
 0x1d7   : > { %v557_v41 = vpop.permute.xlu0 %556  ;;  %v563_v42 = vpop.permute.xlu1 %562 }
 0x1d8   : > { %v582_v43 = vsel %vm578_vm8, %v557_v41, %v559_v38  ;;  %v584_v47 = vsel %vm578_vm8, %v563_v42, %v565_v39  ;;  %v583_v50 = vsel %vm578_vm8, %v561_v40, %v563_v42 }
 0x1d9   : > { %605 = vmatprep.subr.bf16.mxu0 %v582_v43 }
 0x1db   : > { %v555_v44 = vpop.permute.xlu0 %554  ;;  %v571_v45 = vpop.permute.xlu1 %570 }
 0x1dc   : > { %v581_v46 = vsel %vm578_vm8, %v555_v44, %v557_v41 }
 0x1dd   : > { %606 = vmatpush1.bf16.msra.mxu0 %v581_v46 }
 0x1de   : > { %607 = vmatprep.subr.bf16.mxu0 %v584_v47 }
 0x1df   : > { %v567_v48 = vpop.permute.xlu0 %566  ;;  %v575_v49 = vpop.permute.xlu1 %574 }
 0x1e1   : > { %608 = vmatpush1.bf16.msra.mxu0 %v583_v50 }
 0x1e3   : > { %v569_v51 = vpop.permute.xlu0 %568  ;;  %v573_v54 = vpop.permute.xlu1 %572 }
 0x1e4   : > { %v586_v52 = vsel %vm578_vm8, %v569_v51, %v571_v45  ;;  %v585_v53 = vsel %vm578_vm8, %v567_v48, %v569_v51  ;;  %v587_v57 = vsel %vm578_vm8, %v573_v54, %v575_v49 }
 0x1e5   : > { %609 = vmatprep.subr.bf16.mxu0 %v586_v52 }
 0x1e6   : > { %610 = vmatpush1.bf16.msra.mxu0 %v585_v53 }
 0x1e7   : > { %v577_v55 = vpop.permute.xlu0 %576 }
 0x1e8   : > { %v588_v56 = vsel %vm578_vm8, %v575_v49, %v577_v55 }
 0x1e9   : > { %611 = vmatprep.subr.bf16.mxu0 %v588_v56 }
 0x1ea   : > { %612 = vmatpush1.bf16.msra.mxu0 %v587_v57 }
 0x1ed   : > { %904 = vmatmul.mubr.msk.bf16.vlgmr.msra.gmra.mrb[0].mxu0 %vm599_vm9, %v1088_v58 }
 0x1f4   : > { %v541_v7 = vpop.permute.xlu1 %540 }
 0x1f8   : > { %v536_v2 = vpop.permute.xlu0 %535 }
 0x2c0   : > { %v637_v5 = vpop.f32.mrb[0].mxu0 }
 0x2c1   : > { %v638_v8 = vadd.f32 %v637_v5, %v536_v2  ;;  %v639_v9 = vpop.f32.mrb[1].mxu0 }
 0x2c2   : > { %v640_v12 = vadd.f32 %v639_v9, %v536_v2  ;;  %v641_v13 = vpop.f32.mrb[2].mxu0 }
 0x2c3   : > { %v652_v15 = vadd.f32 %v648_v4, %v638_v8  ;;  %v642_v17 = vadd.f32 %v641_v13, %v541_v7  ;;  %v643_v18 = vpop.f32.mrb[3].mxu0 }
 0x2c4   : > { %v653_v19 = vadd.f32 %v649_v6, %v640_v12  ;;  %v644_v20 = vadd.f32 %v643_v18, %v541_v7 }
 0x2c5   : > { %v673_v21 = vsel %vm1896_vm14, %v652_v15, 0.0  ;;  %v654_v22 = vadd.f32 %v650_v10, %v642_v17 }
 0x2c6   : > { %v674_v23 = vsel %vm1900_vm15, %v653_v19, 0.0  ;;  %v655_v24 = vadd.f32 %v651_v14, %v644_v20 }
 0x2c7   : > { %v919_v25 = vpack.c.bf16 %v674_v23, %v673_v21  ;;  %v675_v26 = vsel %vm1896_vm14, %v654_v22, 0.0 }
 0x2c8   : > { %v676_v27 = vsel %vm1900_vm15, %v655_v24, 0.0 }
 0x2c9   : > { %689 = vst [vmem:[%s438_s14] sm:$0xff] %v919_v25  ;;  %v920_v28 = vpack.c.bf16 %v676_v27, %v675_v26 }
 0x2cb   : > { %690 = vst [vmem:[%s438_s14 + $0x8] sm:$0xff] %v920_v28 }
 0x2cc   : > { %1222 = shalt.err (!%p1219_p7)
}
 0x2cd   : > { %s1223_s3 = scalar_lea.hbm %s1918_s20, 256  ;;  %s1227_s27 = scalar_lea.hbm %s2124_s2, 1536 }
 0x2ce   : > { %p1224_p8 = scmp.ne.s32.totalorder %s1918_s20, %s1223_s3  ;;  %p1228_p0 = scmp.lt.u32.totalorder %s1918_s20, %s2124_s2 }
 0x2cf   : > { %p1229_p13 = scmp.lt.u32.totalorder %s1227_s27, %s1223_s3  ;;  %p1231_p1 = scmp.lt.u32.totalorder %s1223_s3, %s1918_s20 }
 0x2d0   : > { %p1225_p12 = pnand %p1224_p8, %p2125_p9 }
 0x2d1   : > { %p1230_p4 = por %p1229_p13, %p1228_p0 }
 0x2d2   : > { %p1226_p5 = pneg %p1225_p12 }
 0x2d3   : > { %p1232_p3 = por %p1231_p1, %p1230_p4 }
 0x2d5   : > { %p1233_p11 = pnand %p1232_p3, %p1226_p5 }
 0x2d7   : > { %1236 = shalt.err (!%p1233_p11)
}
 0x2d8   : > { %s1385_s14 = smov 128   ;;  %s1386_s18 = smov 384  }
 0x2d9   : > { %s1387_s13 = smov 8  }
 0x2da   : > { %934 = dma.vmem_to_hbm [thread:$0]  (%p2125_p9), %s1909_s7, 256, %s1918_s20, %s692_s30, %s1385_s14, %s1386_s18, %s1387_s13  }
 0x2db PF: > { %s2126_s5 = sld [smem:[#allocation16_spill]]  ;;  %s2127_s25 = sld [smem:[#allocation26_spill]] }
 0x2dc   : > { %p954_p2 = scmp.ge.s32.totalorder %s1367_s10, 2 }
 0x2e1   : > { %s722_s21 = sand.u32 1, %s2126_s5   ;;  %p2128_p10 = scmp.ne.s32.totalorder %s2127_s25, 0 }
 0x2e2   : > { %s723_s6 = scalar_lea.sflag [#allocation4], %s722_s21 }
 0x2e3   : > { %p950_p6 = pnand %p954_p2, %p2128_p10 }
 0x2e5   : > { %1310 = dma.done.wait (!%p950_p6), %s723_s6, 256  }
 0x2e6   : > { %1312 = vsyncadd (!%p950_p6), %s723_s6, 4294967040  ;;  %s28_s10 = sadd.s32 1, %s1367_s10   ;;  %s2130_s24 = sld [smem:[#allocation17_spill]] }
 0x2e7   : > { %p1949_p7 = scmp.ge.s32.totalorder %s28_s10, 8   ;;  %s2131_s27 = sld [smem:[#allocation18_spill]] }
 0x2e8   : > { %s2132_s30 = sld [smem:[#allocation21_spill]]  ;;  %s2133_s7 = sld [smem:[#allocation22_spill]] }
 0x2e9   : > { %s2134_s8 = sld [smem:[#allocation23_spill]]  ;;  %s2135_s0 = sld [smem:[#allocation31_spill]] }
 0x2ea   : > { %s2137_s21 = smov %s1319_s22  ;;  %s2138_s22 = smov %s1323_s23 }
 0x2eb   : > { %s2139_s23 = smov %s1737_s16  ;;  %s2140_s25 = smov %s1335_s26 }
 0x2ec   : > { %s2141_s26 = smov %s1663_s1  ;;  %s2142_s28 = smov %s1347_s29 }
 0x2ed   : > { %s2143_s29 = smov %s1658_s4  ;;  %27 = sbr.rel (!%p1949_p7) target bundleno = 22 (0x16), region = 126 }
 0x2ef   : > { %s2144_s9 = smov %s2135_s0 }
 0x2f4   :  { %728 = vsyncpa [#allocation3], 1 }
 0x2f5   :  { %730 = vsyncpa [#allocation3 + $0x1], 1 }
 0x2f6   :  { %731 = vsyncpa [#allocation6], 1 }
 0x2f7   :  { %733 = vsyncpa [#allocation6 + $0x1], 1 }
 0x2f8   :  { %734 = vsyncpa [#allocation9], 1 }
 0x2f9   :  { %736 = vsyncpa [#allocation9 + $0x1], 1 }
 0x2fa   :  { %737 = vsyncpa [#allocation4], 1 }
 0x2fb   :  { %739 = vsyncpa [#allocation4 + $0x1], 1 }

</bundles_post_ra>
